<compile_context>
chip_gen: v6e
topology: v6e:2x2x1
jax: 0.10.0
libtpu: 0.0.40
codegen_flags: <defaults>
</compile_context>

<pallas_src>
import jax
import jax.numpy as jnp
from jax.experimental import pallas as pl
from jax.experimental.pallas import tpu as pltpu

_EPS = 1e-5


def _round_up(a, b):
    return ((a + b - 1) // b) * b


def _packed_ln_kernel(x_ref, w_ref, m_ref, o_ref):
    # x_ref: (TR, 128) lane-dense tile holding p = 128 // C original rows per row.
    # w_ref: (1, 128)  weight tiled p times (f32).
    # m_ref: (128,128) block-diagonal averaging matrix (1/C inside each CxC block).
    x = x_ref[...].astype(jnp.float32)
    m = m_ref[...]
    # Segmented mean / E[x^2] broadcast back to all lanes of each group via the MXU.
    mean = jnp.dot(x, m, preferred_element_type=jnp.float32,
                   precision=jax.lax.Precision.HIGHEST)
    ex2 = jnp.dot(x * x, m, preferred_element_type=jnp.float32,
                  precision=jax.lax.Precision.HIGHEST)
    var = jnp.maximum(ex2 - mean * mean, 0.0)          # one-pass biased variance
    inv = jax.lax.rsqrt(var + _EPS)
    o_ref[...] = (x * inv * w_ref[...]).astype(o_ref.dtype)


def _plain_ln_kernel(x_ref, w_ref, o_ref):
    # Fallback (C does not pack evenly into 128 lanes). x_ref: (TR, C).
    x = x_ref[...].astype(jnp.float32)
    c = x.shape[-1]
    mean = jnp.sum(x, axis=-1, keepdims=True) * (1.0 / c)
    ex2 = jnp.sum(x * x, axis=-1, keepdims=True) * (1.0 / c)
    var = jnp.maximum(ex2 - mean * mean, 0.0)
    inv = jax.lax.rsqrt(var + _EPS)
    o_ref[...] = (x * inv * w_ref[...]).astype(o_ref.dtype)


def biasfree_layernorm(x, weight, *, target_block_bytes=2 << 20):
    """x: [..., C], weight: [C]. Returns same shape/dtype as x."""
    C = x.shape[-1]
    assert weight.shape == (C,)
    orig_shape = x.shape
    out_dtype = x.dtype
    x2 = x.reshape(-1, C)
    R = x2.shape[0]
    itemsize = jnp.dtype(out_dtype).itemsize

    if C <= 128 and 128 % C == 0:
        # ---- lane-dense packed path ----
        p = 128 // C
        W = 128
        Rp = -(-R // p)                                     # packed rows needed
        tr_target = max(8, (target_block_bytes // (W * 4)) // 8 * 8)
        tr = tr_target if Rp >= tr_target else _round_up(Rp, 8)
        Rp_pad = _round_up(Rp, tr)
        pad_rows = Rp_pad * p - R
        if pad_rows:
            x2 = jnp.concatenate(
                [x2, jnp.zeros((pad_rows, C), x2.dtype)], axis=0)
        xp = x2.reshape(Rp_pad, W)                          # free contiguous reshape

        w_row = jnp.tile(weight.astype(jnp.float32), p).reshape(1, W)
        lane = jnp.arange(W)
        seg = lane // C
        avg_mat = (seg[:, None] == seg[None, :]).astype(jnp.float32) / float(C)

        vmem_bytes = (2 * 2 * tr * W * itemsize             # double-buffered x + out
                      + 2 * W * 4 + 2 * W * W * 4           # weight row + avg matrix
                      + (2 << 20))                          # headroom
        vmem_bytes = int(min(max(vmem_bytes, 16 << 20), 32 << 20))

        out = pl.pallas_call(
            _packed_ln_kernel,
            out_shape=jax.ShapeDtypeStruct((Rp_pad, W), out_dtype),
            grid_spec=pltpu.PrefetchScalarGridSpec(
                num_scalar_prefetch=0,
                grid=(Rp_pad // tr,),
                in_specs=[
                    pl.BlockSpec((tr, W), lambda i: (i, 0)),
                    pl.BlockSpec((1, W), lambda i: (0, 0)),
                    pl.BlockSpec((W, W), lambda i: (0, 0)),
                ],
                out_specs=pl.BlockSpec((tr, W), lambda i: (i, 0)),
            ),
            compiler_params=pltpu.CompilerParams(
                dimension_semantics=("parallel",),
                vmem_limit_bytes=vmem_bytes,
            ),
        )(xp, w_row, avg_mat)

        out = out.reshape(Rp_pad * p, C)[:R]
        return out.reshape(orig_shape)

    # ---- fallback path: keep (R, C) layout, big row tiles, one-pass variance ----
    tr_target = max(8, (target_block_bytes // (C * 4)) // 8 * 8)
    tr = tr_target if R >= tr_target else _round_up(R, 8)
    R_pad = _round_up(R, tr)
    if R_pad != R:
        x2 = jnp.concatenate([x2, jnp.zeros((R_pad - R, C), x2.dtype)], axis=0)
    w_row = weight.astype(jnp.float32).reshape(1, C)

    vmem_bytes = int(min(max(2 * 2 * tr * C * itemsize + 2 * C * 4 + (2 << 20),
                             16 << 20), 32 << 20))

    out = pl.pallas_call(
        _plain_ln_kernel,
        out_shape=jax.ShapeDtypeStruct((R_pad, C), out_dtype),
        grid_spec=pltpu.PrefetchScalarGridSpec(
            num_scalar_prefetch=0,
            grid=(R_pad // tr,),
            in_specs=[
                pl.BlockSpec((tr, C), lambda i: (i, 0)),
                pl.BlockSpec((1, C), lambda i: (0, 0)),
            ],
            out_specs=pl.BlockSpec((tr, C), lambda i: (i, 0)),
        ),
        compiler_params=pltpu.CompilerParams(
            dimension_semantics=("parallel",),
            vmem_limit_bytes=vmem_bytes,
        ),
    )(x2, w_row)

    return out[:R].reshape(orig_shape)


def _check(x, weight, **kw):
    out = jax.block_until_ready(biasfree_layernorm(x, weight, **kw))
    xf = x.astype(jnp.float32)
    mean = jnp.mean(xf, axis=-1, keepdims=True)
    var = jnp.mean((xf - mean) ** 2, axis=-1, keepdims=True)
    ref = xf / jnp.sqrt(var + _EPS) * weight.astype(jnp.float32)
    assert out.shape == x.shape and out.dtype == x.dtype
    assert jnp.allclose(out.astype(jnp.float32), ref, atol=1e-5, rtol=1e-5), \
        "mismatch vs reference"


if __name__ == "__main__":
    key = jax.random.PRNGKey(0)
    k1, k2, k3 = jax.random.split(key, 3)

    # Primary case matching the module: (B, L=H*W, C=dim) with H=W=8, dim=32.
    B, L, C = 2, 64, 32
    x = jax.random.normal(k1, (B, L, C), dtype=jnp.float32)
    weight = jnp.ones((C,), dtype=jnp.float32)        # nn.Parameter(torch.ones(C))
    _check(x, weight)

    # Exercise multi-tile grid + zero-pad remainder (small tile forced via kwarg).
    x_b = jax.random.normal(k2, (2, 400, 32), dtype=jnp.float32)   # H=W=20
    _check(x_b, weight, target_block_bytes=64 * 1024)

    # Exercise the fallback (C not dividing 128) path.
    x_c = jax.random.normal(k3, (2, 64, 48), dtype=jnp.float32)
    _check(x_c, jnp.ones((48,), dtype=jnp.float32))

    print("KERNEL_OK")
</pallas_src>

<mosaic_0001>
module attributes {stable_mosaic.version = 11 : i64} {
  func.func @_packed_ln_kernel(%arg0: i32, %arg1: memref<32x128xf32, #tpu.memory_space<vmem>>, %arg2: memref<1x128xf32, #tpu.memory_space<vmem>>, %arg3: memref<128x128xf32, #tpu.memory_space<vmem>>, %arg4: memref<32x128xf32, #tpu.memory_space<vmem>>) attributes {dimension_semantics = [#tpu.dimension_semantics<parallel>], iteration_bounds = array<i64: 1>, scalar_prefetch = 0 : i64, scratch_operands = 0 : i64, tpu.core_type = #tpu.core_type<tc>, window_params = [{transform_indices = @transform_0, window_bounds = array<i64: 32, 128>}, {pipeline_mode = #tpu.pipeline_mode<synchronous>, transform_indices = @transform_1, window_bounds = array<i64: 1, 128>}, {pipeline_mode = #tpu.pipeline_mode<synchronous>, transform_indices = @transform_2, window_bounds = array<i64: 128, 128>}, {transform_indices = @transform_3, window_bounds = array<i64: 32, 128>}]} {
    %c0 = arith.constant 0 : index
    %c0_0 = arith.constant 0 : index
    %0 = vector.load %arg1[%c0, %c0_0] : memref<32x128xf32, #tpu.memory_space<vmem>>, vector<32x128xf32>
    %c0_1 = arith.constant 0 : index
    %c0_2 = arith.constant 0 : index
    %1 = vector.load %arg3[%c0_1, %c0_2] : memref<128x128xf32, #tpu.memory_space<vmem>>, vector<128x128xf32>
    %cst = arith.constant dense<0.000000e+00> : vector<32x128xf32>
    %2 = tpu.matmul %0, %1, %cst {dimension_numbers = #tpu.dot_dimension_numbers<[1], [0], [0], [1], [0, 0, 1, 1], [], []>, precision = #tpu.contract_precision<fp32>} : vector<32x128xf32>, vector<128x128xf32>, vector<32x128xf32> -> vector<32x128xf32>
    %3 = arith.mulf %0, %0 : vector<32x128xf32>
    %cst_3 = arith.constant dense<0.000000e+00> : vector<32x128xf32>
    %4 = tpu.matmul %3, %1, %cst_3 {dimension_numbers = #tpu.dot_dimension_numbers<[1], [0], [0], [1], [0, 0, 1, 1], [], []>, precision = #tpu.contract_precision<fp32>} : vector<32x128xf32>, vector<128x128xf32>, vector<32x128xf32> -> vector<32x128xf32>
    %5 = arith.mulf %2, %2 : vector<32x128xf32>
    %6 = arith.subf %4, %5 : vector<32x128xf32>
    %cst_4 = arith.constant 0.000000e+00 : f32
    %7 = vector.broadcast %cst_4 : f32 to vector<32x128xf32>
    %8 = arith.maximumf %6, %7 : vector<32x128xf32>
    %cst_5 = arith.constant 9.99999974E-6 : f32
    %9 = vector.broadcast %cst_5 : f32 to vector<32x128xf32>
    %10 = arith.addf %8, %9 : vector<32x128xf32>
    %11 = math.rsqrt %10 : vector<32x128xf32>
    %12 = arith.mulf %0, %11 : vector<32x128xf32>
    %c0_6 = arith.constant 0 : index
    %c0_7 = arith.constant 0 : index
    %13 = vector.load %arg2[%c0_6, %c0_7] : memref<1x128xf32, #tpu.memory_space<vmem>>, vector<1x128xf32>
    %14 = vector.broadcast %13 : vector<1x128xf32> to vector<32x128xf32>
    %15 = arith.mulf %12, %14 : vector<32x128xf32>
    %c0_8 = arith.constant 0 : index
    %c0_9 = arith.constant 0 : index
    %16 = vector.load %arg4[%c0_8, %c0_9] : memref<32x128xf32, #tpu.memory_space<vmem>>, vector<32x128xf32>
    tpu.vector_store %arg4[%c0_8, %c0_9], %15 {strides = array<i32>} : memref<32x128xf32, #tpu.memory_space<vmem>>, vector<32x128xf32>,
    return
  }
  func.func @transform_0(%arg0: i32) -> (i32, i32) {
    %c0_i32 = arith.constant 0 : i32
    %c0_i32_0 = arith.constant 0 : i32
    return %arg0, %c0_i32 : i32, i32
  }
  func.func @transform_1(%arg0: i32) -> (i32, i32) {
    %c0_i32 = arith.constant 0 : i32
    %c0_i32_0 = arith.constant 0 : i32
    %c0_i32_1 = arith.constant 0 : i32
    return %c0_i32, %c0_i32_0 : i32, i32
  }
  func.func @transform_2(%arg0: i32) -> (i32, i32) {
    %c0_i32 = arith.constant 0 : i32
    %c0_i32_0 = arith.constant 0 : i32
    %c0_i32_1 = arith.constant 0 : i32
    return %c0_i32, %c0_i32_0 : i32, i32
  }
  func.func @transform_3(%arg0: i32) -> (i32, i32) {
    %c0_i32 = arith.constant 0 : i32
    %c0_i32_0 = arith.constant 0 : i32
    return %arg0, %c0_i32 : i32, i32
  }
}

</mosaic_0001>

<bundles_post_ra>
// kernel: tpu_custom_call.1
= control target key start
LH: loop header
LB: loop body
LE: loop exit
PB: predicated region body
PF: predicated region fallthrough
CT: control target
= control target key end

     0   :  { %8 = vsyncpa [#allocation3], 0  ;;  %s3210_s0 = inlined_call_operand.hbm [shape: f32[32,128], index: 0, kind: input, shape index: {}]   ;;  %s3211_s1 = inlined_call_operand.vmem [shape: f32[1,128], index: 1, kind: input, shape index: {}]   ;;  %s3212_s2 = inlined_call_operand.hbm [shape: f32[128,128], index: 2, kind: input, shape index: {}]   ;;  %s3213_s3 = inlined_call_operand.hbm [shape: f32[32,128], index: 3, kind: output, shape index: {}]  }
   0x1   :  { %9 = vsyncpa [#allocation6], 0 }
   0x2   :  { %10 = vsyncpa [#allocation4], 0  ;;  %s2443_s12 = smov [#allocation2]  }
   0x3   :  { %s16_s13 = sshll.u32 %s2443_s12, 4  ;;  %s17_s13 = int_to_ptr.vmem [resolvable:$true] %s16_s13 }
   0x4   :  { %s2385_s14 = scalar_lea.vmem %s17_s13, 512  ;;  %p2390_p1 = scmp.lt.s32.totalorder %s17_s13, %s17_s13 }
   0x5   :  { %p2386_p0 = scmp.ne.s32.totalorder %s17_s13, %s2385_s14  ;;  %p2391_p2 = scmp.lt.s32.totalorder %s2385_s14, %s2385_s14 }
   0x7   :  { %p2392_p3 = por %p2391_p2, %p2390_p1 }
   0x9   :  { %p2393_p4 = pnand %p2392_p3, %p2386_p0 }
   0xb   :  { %2396 = shalt.err (!%p2393_p4)
}
   0xc   :  { %s2444_s15 = smov 128   ;;  %s2445_s16 = smov 8  }
   0xd   :  { %22 = dma.hbm_to_vmem [thread:$0]  %s3210_s0, 512, %s17_s13, [#allocation3], %s2444_s15, %s2444_s15, %s2445_s16  }
   0xe   :  { %s2446_s19 = smov [#allocation5]  }
   0xf   :  { %s30_s20 = sshll.u32 %s2446_s19, 4  ;;  %s31_s20 = int_to_ptr.vmem [resolvable:$true] %s30_s20 }
  0x10   :  { %s2405_s21 = scalar_lea.vmem %s31_s20, 2048  ;;  %p2410_p6 = scmp.lt.s32.totalorder %s31_s20, %s31_s20 }
  0x11   :  { %p2406_p5 = scmp.ne.s32.totalorder %s31_s20, %s2405_s21  ;;  %p2411_p7 = scmp.lt.s32.totalorder %s2405_s21, %s2405_s21 }
  0x13   :  { %p2412_p8 = por %p2411_p7, %p2410_p6 }
  0x15   :  { %p2413_p9 = pnand %p2412_p8, %p2406_p5 }
  0x17   :  { %2416 = shalt.err (!%p2413_p9)
}
  0x18   :  { %36 = dma.hbm_to_vmem [thread:$0]  %s3212_s2, 2048, %s31_s20, [#allocation6], %s2444_s15, %s2444_s15, %s2445_s16  }
  0x19   :  { %2437 = dma.done.wait [#allocation3], 512  }
  0x1a   :  { %2438 = vsyncadd [#allocation3], 4294966784 }
  0x1b   :  { %2439 = dma.done.wait [#allocation6], 2048  }
  0x1c   :  { %2440 = vsyncadd [#allocation6], 4294965248  ;;  %v62_v0 = vld [vmem:[#allocation5 + $0x78] sm:$0xff]  ;;  %v61_v1 = vld [vmem:[#allocation5 + $0x70] sm:$0xff]  ;;  %s2447_s24 = smov [#allocation7]  }
  0x1d   :  { %v60_v2 = vld [vmem:[#allocation5 + $0x68] sm:$0xff]  ;;  %v2480_v3 = vand.u32 4294901760, %v62_v0  ;;  %v2482_v4 = vand.u32 4294901760, %v61_v1  ;;  %v59_v6 = vld [vmem:[#allocation5 + $0x60] sm:$0xff]  ;;  %v58_v7 = vld [vmem:[#allocation5 + $0x58] sm:$0xff]  ;;  %s1651_s25 = sshll.u32 %s2447_s24, 4  ;;  %s1652_s25 = int_to_ptr.vmem [resolvable:$true] %s1651_s25 }
  0x1e   :  { %v2484_v5 = vand.u32 4294901760, %v60_v2  ;;  %v57_v8 = vld [vmem:[#allocation5 + $0x50] sm:$0xff]  ;;  %v2486_v9 = vand.u32 4294901760, %v59_v6  ;;  %v2488_v10 = vand.u32 4294901760, %v58_v7  ;;  %v56_v12 = vld [vmem:[#allocation5 + $0x48] sm:$0xff]  ;;  %v55_v13 = vld [vmem:[#allocation5 + $0x40] sm:$0xff]  ;;  %p2422_p11 = scmp.lt.s32.totalorder %s1652_s25, %s1652_s25 }
  0x1f   :  { %v2490_v11 = vand.u32 4294901760, %v57_v8  ;;  %1905 = vmatprep.subr.mxu0 %v2480_v3  ;;  %v2494_v14 = vsub.f32 %v62_v0, %v2480_v3  ;;  %v2497_v15 = vsub.f32 %v61_v1, %v2482_v4  ;;  %v2499_v16 = vand.u32 4294901760, %v56_v12  ;;  %v54_v18 = vld [vmem:[#allocation5 + $0x38] sm:$0xff]  ;;  %v53_v25 = vld [vmem:[#allocation5 + $0x30] sm:$0xff]  ;;  %v52_v35 = vld [vmem:[#allocation5 + $0x28] sm:$0xff] }
  0x20   :  { %v2502_v17 = vsub.f32 %v60_v2, %v2484_v5  ;;  %1906 = vmatpush3.msra.mxu0 %v2480_v3  ;;  %v2506_v19 = vsub.f32 %v59_v6, %v2486_v9  ;;  %v2509_v20 = vsub.f32 %v58_v7, %v2488_v10  ;;  %v2521_v24 = vand.u32 4294901760, %v55_v13  ;;  %v51_v40 = vld [vmem:[#allocation5 + $0x20] sm:$0xff]  ;;  %v50_v48 = vld [vmem:[#allocation5 + $0x18] sm:$0xff]  ;;  %v2594_v54 = vld [vmem:[#allocation2 + $0x8] sm:$0xff] }
  0x21   :  { %1907 = vmatprep.subr.mxu0 %v2482_v4  ;;  %v2513_v21 = vand.u32 4294901760, %v2494_v14  ;;  %v2516_v22 = vand.u32 4294901760, %v2497_v15  ;;  %v2527_v27 = vand.u32 4294901760, %v54_v18  ;;  %v2533_v29 = vsub.f32 %v57_v8, %v2490_v11  ;;  %v2580_v49 = vld [vmem:[#allocation2] sm:$0xff]  ;;  %3257 = vst [vmem:[#allocation21_spill] sm:$0xff] %v2594_v54  ;;  %v49_v59 = vld [vmem:[#allocation5 + $0x10] sm:$0xff] }
  0x22   :  { %3247 = vst [vmem:[#allocation11_spill] sm:$0xff] %v2506_v19  ;;  %3248 = vst [vmem:[#allocation12_spill] sm:$0xff] %v2509_v20  ;;  %v2519_v23 = vand.u32 4294901760, %v2502_v17  ;;  %1908 = vmatpush3.msra.mxu0 %v2482_v4  ;;  %v2525_v26 = vand.u32 4294901760, %v2506_v19  ;;  %v2530_v28 = vand.u32 4294901760, %v2509_v20  ;;  %v2543_v33 = vsub.f32 %v56_v12, %v2499_v16  ;;  %v48_v2 = vld [vmem:[#allocation5 + $0x8] sm:$0xff] }
  0x23   :  { %3249 = vst [vmem:[#allocation13_spill] sm:$0xff] %v2533_v29  ;;  %1909 = vmatprep.subr.mxu0 %v2484_v5  ;;  %v188_v30 = vsub.f32 %v2494_v14, %v2513_v21  ;;  %v195_v31 = vsub.f32 %v2497_v15, %v2516_v22  ;;  %v2546_v34 = vand.u32 4294901760, %v53_v25  ;;  %v2556_v39 = vand.u32 4294901760, %v2533_v29  ;;  %3254 = vst [vmem:[#allocation18_spill] sm:$0xff] %v2580_v49 }
  0x24   :  { %v202_v32 = vsub.f32 %v2502_v17, %v2519_v23  ;;  %1910 = vmatpush3.msra.mxu0 %v2484_v5  ;;  %v209_v38 = vsub.f32 %v2506_v19, %v2525_v26  ;;  %v216_v41 = vsub.f32 %v2509_v20, %v2530_v28  ;;  %v2562_v42 = vand.u32 4294901760, %v2543_v33 }
  0x25   :  { %1911 = vmatprep.subr.mxu0 %v2486_v9  ;;  %v2549_v36 = vand.u32 4294901760, %v188_v30  ;;  %v2551_v37 = vand.u32 4294901760, %v195_v31  ;;  %v2565_v43 = vsub.f32 %v55_v13, %v2521_v24  ;;  %v2571_v45 = vand.u32 4294901760, %v52_v35 }
  0x26   :  { %1912 = vmatpush3.msra.mxu0 %v2486_v9  ;;  %v2569_v44 = vand.u32 4294901760, %v202_v32  ;;  %v2574_v46 = vsub.f32 %v54_v18, %v2527_v27  ;;  %v2578_v47 = vand.u32 4294901760, %v51_v40  ;;  %v2584_v50 = vand.u32 4294901760, %v209_v38  ;;  %v47_v18 = vld [vmem:[#allocation5] sm:$0xff] }
  0x27   :  { %3250 = vst [vmem:[#allocation14_spill] sm:$0xff] %v2551_v37  ;;  %3251 = vst [vmem:[#allocation15_spill] sm:$0xff] %v2565_v43  ;;  %1913 = vmatprep.subr.mxu0 %v2488_v10  ;;  %1943 = vmatprep.subr.mxu1 %v2549_v36  ;;  %v223_v51 = vsub.f32 %v2533_v29, %v2556_v39  ;;  %v2589_v52 = vand.u32 4294901760, %v2565_v43  ;;  %v2592_v53 = vsub.f32 %v53_v25, %v2546_v34 }
  0x28   :  { %3252 = vst [vmem:[#allocation16_spill] sm:$0xff] %v2569_v44  ;;  %3253 = vst [vmem:[#allocation17_spill] sm:$0xff] %v2574_v46  ;;  %1914 = vmatpush3.msra.mxu0 %v2488_v10  ;;  %1944 = vmatpush3.msra.mxu1 %v2549_v36  ;;  %v2598_v55 = vand.u32 4294901760, %v216_v41  ;;  %v230_v56 = vsub.f32 %v2543_v33, %v2562_v42  ;;  %v2604_v57 = vand.u32 4294901760, %v50_v48  ;;  %v2607_v58 = vand.u32 4294901760, %v2574_v46 }
  0x29   :  { %1915 = vmatprep.subr.mxu0 %v2490_v11  ;;  %1945 = vmatprep.subr.mxu1 %v2551_v37  ;;  %3255 = vst [vmem:[#allocation19_spill] sm:$0xff] %v2584_v50  ;;  %3256 = vst [vmem:[#allocation20_spill] sm:$0xff] %v2592_v53  ;;  %v2610_v60 = vsub.f32 %v52_v35, %v2571_v45  ;;  %v2613_v61 = vand.u32 4294901760, %v2580_v49  ;;  %v2618_v62 = vand.u32 4294901760, %v2594_v54  ;;  %v2622_v63 = vand.u32 4294901760, %v223_v51 }
  0x2a   :  { %1916 = vmatpush3.msra.mxu0 %v2490_v11  ;;  %1946 = vmatpush3.msra.mxu1 %v2551_v37  ;;  %3258 = vst [vmem:[#allocation22_spill] sm:$0xff] %v2598_v55  ;;  %v237_v0 = vsub.f32 %v2565_v43, %v2589_v52  ;;  %v2627_v1 = vand.u32 4294901760, %v2592_v53  ;;  %v2630_v6 = vsub.f32 %v51_v40, %v2578_v47  ;;  %v2634_v7 = vand.u32 4294901760, %v230_v56 }
  0x2b   :  { %1917 = vmatprep.subr.mxu0 %v2499_v16  ;;  %1947 = vmatprep.subr.mxu1 %v2569_v44  ;;  %3259 = vst [vmem:[#allocation23_spill] sm:$0xff] %v2622_v63  ;;  %v2636_v8 = vand.u32 4294901760, %v49_v59  ;;  %v244_v12 = vsub.f32 %v2574_v46, %v2607_v58  ;;  %v2643_v13 = vand.u32 4294901760, %v2610_v60  ;;  %v2647_v25 = vsub.f32 %v2580_v49, %v2613_v61 }
  0x2c   :  { %1918 = vmatpush3.msra.mxu0 %v2499_v16  ;;  %1948 = vmatpush3.msra.mxu1 %v2569_v44  ;;  %3260 = vst [vmem:[#allocation24_spill] sm:$0xff] %v2634_v7  ;;  %v2650_v30 = vsub.f32 %v50_v48, %v2604_v57  ;;  %v2654_v31 = vand.u32 4294901760, %v48_v2  ;;  %v2658_v32 = vsub.f32 %v2594_v54, %v2618_v62  ;;  %v2662_v35 = vand.u32 4294901760, %v237_v0 }
  0x2d   :  { %1919 = vmatprep.subr.mxu0 %v2521_v24  ;;  %1949 = vmatprep.subr.mxu1 %v2584_v50  ;;  %v251_v38 = vsub.f32 %v2592_v53, %v2627_v1  ;;  %v2667_v40 = vand.u32 4294901760, %v2630_v6  ;;  %v2671_v41 = vand.u32 4294901760, %v47_v18  ;;  %v2674_v48 = vsub.f32 %v49_v59, %v2636_v8 }
  0x2e   :  { %1920 = vmatpush3.msra.mxu0 %v2521_v24  ;;  %1950 = vmatpush3.msra.mxu1 %v2584_v50  ;;  %3261 = vst [vmem:[#allocation25_spill] sm:$0xff] %v2662_v35  ;;  %v2678_v51 = vand.u32 4294901760, %v244_v12  ;;  %v258_v56 = vsub.f32 %v2610_v60, %v2643_v13 }
  0x2f   :  { %1921 = vmatprep.subr.mxu0 %v2527_v27  ;;  %1951 = vmatprep.subr.mxu1 %v2598_v55  ;;  %v2694_v12 = vand.u32 4294901760, %v251_v38  ;;  %v265_v0 = vsub.f32 %v2630_v6, %v2667_v40  ;;  %v2704_v59 = vsub.f32 %v47_v18, %v2671_v41  ;;  %v3264_v38 = vand.u32 4294901760, %v2647_v25 }
  0x30   :  { %1922 = vmatpush3.msra.mxu0 %v2527_v27  ;;  %1952 = vmatpush3.msra.mxu1 %v2598_v55  ;;  %3262 = vst [vmem:[#allocation26_spill] sm:$0xff] %v2678_v51  ;;  %v2684_v55 = vand.u32 4294901760, %v2650_v30  ;;  %v3265_v18 = vand.u32 4294901760, %v2658_v32 }
  0x31   :  { %1923 = vmatprep.subr.mxu0 %v2546_v34  ;;  %1953 = vmatprep.subr.mxu1 %v2622_v63  ;;  %3263 = vst [vmem:[#allocation27_spill] sm:$0xff] %v2694_v12  ;;  %v147_v50 = vsub.f32 %v2647_v25, %v3264_v38 }
  0x32   :  { %1924 = vmatpush3.msra.mxu0 %v2546_v34  ;;  %1954 = vmatpush3.msra.mxu1 %v2622_v63  ;;  %v2690_v63 = vsub.f32 %v48_v2, %v2654_v31  ;;  %v2708_v2 = vand.u32 4294901760, %v258_v56  ;;  %v272_v44 = vsub.f32 %v2650_v30, %v2684_v55  ;;  %v2725_v56 = vand.u32 4294901760, %v265_v0 }
  0x33   :  { %1925 = vmatprep.subr.mxu0 %v2571_v45  ;;  %1955 = vmatprep.subr.mxu1 %v2634_v7 }
  0x34   :  { %1926 = vmatpush3.msra.mxu0 %v2571_v45  ;;  %1956 = vmatpush3.msra.mxu1 %v2634_v7  ;;  %v2701_v7 = vand.u32 4294901760, %v2674_v48  ;;  %v2721_v37 = vand.u32 4294901760, %v2690_v63  ;;  %v2736_v54 = vand.u32 4294901760, %v272_v44 }
  0x35   :  { %1927 = vmatprep.subr.mxu0 %v2578_v47  ;;  %1957 = vmatprep.subr.mxu1 %v2662_v35 }
  0x36   :  { %1928 = vmatpush3.msra.mxu0 %v2578_v47  ;;  %1958 = vmatpush3.msra.mxu1 %v2662_v35  ;;  %v157_v35 = vsub.f32 %v2658_v32, %v3265_v18  ;;  %v279_v38 = vsub.f32 %v2674_v48, %v2701_v7  ;;  %v148_v18 = vand.u32 4294901760, %v147_v50 }
  0x37   :  { %1929 = vmatprep.subr.mxu0 %v2604_v57  ;;  %1959 = vmatprep.subr.mxu1 %v2678_v51 }
  0x38   :  { %1930 = vmatpush3.msra.mxu0 %v2604_v57  ;;  %1960 = vmatpush3.msra.mxu1 %v2678_v51  ;;  %v2732_v51 = vand.u32 4294901760, %v2704_v59  ;;  %v158_v0 = vand.u32 4294901760, %v157_v35  ;;  %v2746_v49 = vand.u32 4294901760, %v279_v38  ;;  %v2770_v38 = vld [vmem:[#allocation2 + $0x18] sm:$0xff] }
  0x39   :  { %1931 = vmatprep.subr.mxu0 %v2636_v8  ;;  %1961 = vmatprep.subr.mxu1 %v2694_v12 }
  0x3a   :  { %1932 = vmatpush3.msra.mxu0 %v2636_v8  ;;  %1962 = vmatpush3.msra.mxu1 %v2694_v12  ;;  %v286_v12 = vsub.f32 %v2690_v63, %v2721_v37  ;;  %v293_v44 = vsub.f32 %v2704_v59, %v2732_v51 }
  0x3b   :  { %1933 = vmatprep.subr.mxu0 %v2654_v31  ;;  %1963 = vmatprep.subr.mxu1 %v2708_v2 }
  0x3c   :  { %1934 = vmatpush3.msra.mxu0 %v2654_v31  ;;  %1964 = vmatpush3.msra.mxu1 %v2708_v2  ;;  %v2752_v50 = vand.u32 4294901760, %v286_v12  ;;  %v2758_v35 = vand.u32 4294901760, %v293_v44  ;;  %v2766_v12 = vld [vmem:[#allocation2 + $0x10] sm:$0xff] }
  0x3d   :  { %1935 = vmatprep.subr.mxu0 %v2671_v41  ;;  %1965 = vmatprep.subr.mxu1 %v2725_v56 }
  0x3e   :  { %1936 = vmatpush3.msra.mxu0 %v2671_v41  ;;  %1966 = vmatpush3.msra.mxu1 %v2725_v56 }
  0x3f   :  { %1937 = vmatprep.mubr.f32.mxu0 %v148_v18  ;;  %1967 = vmatprep.subr.mxu1 %v2736_v54  ;;  %v2777_v18 = vand.u32 4294901760, %v2766_v12 }
  0x40   :  { %1981 = vmatprep.subr.mxu0 %v2494_v14  ;;  %1938 = vmatmul.mubr.f32.vlgmr.msra.gmra.mxu0 %v158_v0  ;;  %v2782_v0 = vand.u32 4294901760, %v2770_v38 }
  0x41   :  { %1968 = vmatpush3.msra.mxu1 %v2736_v54  ;;  %1982 = vmatpush3.msra.mxu0 %v2494_v14  ;;  %v2792_v44 = vsub.f32 %v2766_v12, %v2777_v18 }
  0x42   :  { %1969 = vmatprep.subr.mxu1 %v2746_v49  ;;  %1983 = vmatprep.subr.mxu0 %v2497_v15 }
  0x43   :  { %1970 = vmatpush3.msra.mxu1 %v2746_v49  ;;  %1984 = vmatpush3.msra.mxu0 %v2497_v15 }
  0x44   :  { %1971 = vmatprep.subr.mxu1 %v2752_v50  ;;  %1985 = vmatprep.subr.mxu0 %v2502_v17 }
  0x45   :  { %1972 = vmatpush3.msra.mxu1 %v2752_v50  ;;  %1986 = vmatpush3.msra.mxu0 %v2502_v17 }
  0x46   :  { %1973 = vmatprep.subr.mxu1 %v2758_v35  ;;  %1987 = vmatprep.subr.mxu0 %v2506_v19 }
  0x47   :  { %1974 = vmatpush3.msra.mxu1 %v2758_v35  ;;  %1975 = vmatprep.mubr.f32.mxu1 %v2613_v61 }
  0x48   :  { %1988 = vmatpush3.msra.mxu0 %v2506_v19  ;;  %1976 = vmatmul.mubr.f32.vlgmr.msra.gmra.mxu1 %v2618_v62 }
  0x49   :  { %1989 = vmatprep.subr.mxu0 %v2509_v20  ;;  %2019 = vmatprep.subr.mxu1 %v2480_v3 }
  0x4a   :  { %1990 = vmatpush3.msra.mxu0 %v2509_v20  ;;  %2020 = vmatpush3.msra.mxu1 %v2480_v3  ;;  %v2798_v20 = vsub.f32 %v2770_v38, %v2782_v0 }
  0x4b   :  { %1991 = vmatprep.subr.mxu0 %v2533_v29  ;;  %2021 = vmatprep.subr.mxu1 %v2482_v4 }
  0x4c   :  { %1992 = vmatpush3.msra.mxu0 %v2533_v29  ;;  %2022 = vmatpush3.msra.mxu1 %v2482_v4  ;;  %v3244_v29 = vand.u32 4294901760, %v2792_v44  ;;  %v176_v19 = vand.u32 4294901760, %v2798_v20 }
  0x4d   :  { %1993 = vmatprep.subr.mxu0 %v2543_v33  ;;  %2023 = vmatprep.subr.mxu1 %v2484_v5 }
  0x4e   :  { %1994 = vmatpush3.msra.mxu0 %v2543_v33  ;;  %2024 = vmatpush3.msra.mxu1 %v2484_v5 }
  0x4f   :  { %1995 = vmatprep.subr.mxu0 %v2565_v43  ;;  %2025 = vmatprep.subr.mxu1 %v2486_v9 }
  0x50   :  { %1996 = vmatpush3.msra.mxu0 %v2565_v43  ;;  %2026 = vmatpush3.msra.mxu1 %v2486_v9  ;;  %v167_v43 = vsub.f32 %v2792_v44, %v3244_v29 }
  0x51   :  { %1997 = vmatprep.subr.mxu0 %v2574_v46  ;;  %2027 = vmatprep.subr.mxu1 %v2488_v10 }
  0x52   :  { %1998 = vmatpush3.msra.mxu0 %v2574_v46  ;;  %2028 = vmatpush3.msra.mxu1 %v2488_v10  ;;  %v177_v46 = vsub.f32 %v2798_v20, %v176_v19  ;;  %v168_v29 = vand.u32 4294901760, %v167_v43  ;;  %v3267_v43 = vand.u32 4294901760, %v2658_v32 }
  0x53   :  { %1999 = vmatprep.subr.mxu0 %v2592_v53  ;;  %2029 = vmatprep.subr.mxu1 %v2490_v11 }
  0x54   :  { %2000 = vmatpush3.msra.mxu0 %v2592_v53  ;;  %2030 = vmatpush3.msra.mxu1 %v2490_v11  ;;  %v178_v53 = vand.u32 4294901760, %v177_v46  ;;  %v3268_v46 = vand.u32 4294901760, %v2792_v44 }
  0x55   :  { %2001 = vmatprep.subr.mxu0 %v2610_v60  ;;  %2031 = vmatprep.subr.mxu1 %v2499_v16 }
  0x56   :  { %2002 = vmatpush3.msra.mxu0 %v2610_v60  ;;  %2032 = vmatpush3.msra.mxu1 %v2499_v16 }
  0x57   :  { %2003 = vmatprep.subr.mxu0 %v2630_v6  ;;  %2033 = vmatprep.subr.mxu1 %v2521_v24 }
  0x58   :  { %2004 = vmatpush3.msra.mxu0 %v2630_v6  ;;  %2034 = vmatpush3.msra.mxu1 %v2521_v24 }
  0x59   :  { %2005 = vmatprep.subr.mxu0 %v2650_v30  ;;  %2035 = vmatprep.subr.mxu1 %v2527_v27 }
  0x5a   :  { %2006 = vmatpush3.msra.mxu0 %v2650_v30  ;;  %2036 = vmatpush3.msra.mxu1 %v2527_v27 }
  0x5b   :  { %2007 = vmatprep.subr.mxu0 %v2674_v48  ;;  %2037 = vmatprep.subr.mxu1 %v2546_v34 }
  0x5c   :  { %1940 = vmatprep.mubr.f32.mxu0 %v168_v29  ;;  %2008 = vmatpush3.msra.mxu0 %v2674_v48  ;;  %v3266_v29 = vand.u32 4294901760, %v2647_v25 }
  0x5d   :  { %2038 = vmatpush3.msra.mxu1 %v2546_v34  ;;  %1941 = vmatmul.mubr.f32.gmra.mxu0 %v178_v53  ;;  %v3270_v53 = vld [vmem:[#allocation21_spill] sm:$0xff] }
  0x5e   :  { %2009 = vmatprep.subr.mxu0 %v2690_v63  ;;  %2039 = vmatprep.subr.mxu1 %v2571_v45 }
  0x5f   :  { %2010 = vmatpush3.msra.mxu0 %v2690_v63  ;;  %2040 = vmatpush3.msra.mxu1 %v2571_v45 }
  0x60   :  { %2011 = vmatprep.subr.mxu0 %v2704_v59  ;;  %2041 = vmatprep.subr.mxu1 %v2578_v47 }
  0x61   :  { %2012 = vmatpush3.msra.mxu0 %v2704_v59  ;;  %2013 = vmatprep.mubr.f32.mxu0 %v2647_v25  ;;  %v834_v25 = vmul.f32 %v3270_v53, %v3270_v53  ;;  %v3277_v53 = vld [vmem:[#allocation25_spill] sm:$0xff] }
  0x62   :  { %2042 = vmatpush3.msra.mxu1 %v2578_v47  ;;  %1978 = vmatprep.mubr.f32.mxu1 %v2777_v18 }
  0x63   :  { %2014 = vmatmul.mubr.f32.vlgmr.msra.gmra.mxu0 %v2658_v32  ;;  %2043 = vmatprep.subr.mxu1 %v2604_v57  ;;  %v2964_v32 = vand.u32 4294901760, %v834_v25 }
  0x64   :  { %2057 = vmatprep.subr.mxu0 %v2513_v21  ;;  %1979 = vmatmul.mubr.f32.gmra.mxu1 %v2782_v0 }
  0x65   :  { %2044 = vmatpush3.msra.mxu1 %v2604_v57  ;;  %2058 = vmatpush3.msra.mxu0 %v2513_v21 }
  0x66   :  { %2045 = vmatprep.subr.mxu1 %v2636_v8  ;;  %2059 = vmatprep.subr.mxu0 %v2516_v22 }
  0x67   :  { %2016 = vmatprep.mubr.f32.mxu0 %v2792_v44  ;;  %2046 = vmatpush3.msra.mxu1 %v2636_v8 }
  0x68   :  { %2060 = vmatpush3.msra.mxu0 %v2516_v22  ;;  %2047 = vmatprep.subr.mxu1 %v2654_v31 }
  0x69   :  { %2017 = vmatmul.mubr.f32.gmra.mxu0 %v2798_v20  ;;  %2061 = vmatprep.subr.mxu0 %v2519_v23 }
  0x6a   :  { %2048 = vmatpush3.msra.mxu1 %v2654_v31  ;;  %2062 = vmatpush3.msra.mxu0 %v2519_v23 }
  0x6b   :  { %2049 = vmatprep.subr.mxu1 %v2671_v41  ;;  %2063 = vmatprep.subr.mxu0 %v2525_v26 }
  0x6c   :  { %2050 = vmatpush3.msra.mxu1 %v2671_v41  ;;  %2051 = vmatprep.mubr.f32.mxu1 %v3266_v29  ;;  %v2980_v29 = vsub.f32 %v834_v25, %v2964_v32  ;;  %v3278_v25 = vld [vmem:[#allocation26_spill] sm:$0xff] }
  0x6d   :  { %2064 = vmatpush3.msra.mxu0 %v2525_v26  ;;  %2052 = vmatmul.mubr.f32.vlgmr.msra.gmra.mxu1 %v3267_v43  ;;  %v3275_v43 = vld [vmem:[#allocation23_spill] sm:$0xff] }
  0x6e   :  { %2065 = vmatprep.subr.mxu0 %v2530_v28  ;;  %2095 = vmatprep.subr.mxu1 %v2480_v3 }
  0x6f   :  { %2066 = vmatpush3.msra.mxu0 %v2530_v28  ;;  %2096 = vmatpush3.msra.mxu1 %v2480_v3 }
  0x70   :  { %2067 = vmatprep.subr.mxu0 %v2556_v39  ;;  %2097 = vmatprep.subr.mxu1 %v2482_v4 }
  0x71   :  { %2054 = vmatprep.mubr.f32.mxu1 %v3268_v46  ;;  %2068 = vmatpush3.msra.mxu0 %v2556_v39  ;;  %v3276_v46 = vld [vmem:[#allocation24_spill] sm:$0xff] }
  0x72   :  { %2098 = vmatpush3.msra.mxu1 %v2482_v4  ;;  %2069 = vmatprep.subr.mxu0 %v2562_v42 }
  0x73   :  { %2055 = vmatmul.mubr.f32.gmra.mxu1 %v176_v19  ;;  %2099 = vmatprep.subr.mxu1 %v2484_v5  ;;  %v3269_v19 = vld [vmem:[#allocation18_spill] sm:$0xff] }
  0x74   :  { %2070 = vmatpush3.msra.mxu0 %v2562_v42  ;;  %2100 = vmatpush3.msra.mxu1 %v2484_v5  ;;  %v833_v20 = vmul.f32 %v3269_v19, %v3269_v19 }
  0x75   :  { %2071 = vmatprep.subr.mxu0 %v2589_v52  ;;  %2101 = vmatprep.subr.mxu1 %v2486_v9 }
  0x76   :  { %2072 = vmatpush3.msra.mxu0 %v2589_v52  ;;  %2102 = vmatpush3.msra.mxu1 %v2486_v9 }
  0x77   :  { %2073 = vmatprep.subr.mxu0 %v2607_v58  ;;  %2103 = vmatprep.subr.mxu1 %v2488_v10 }
  0x78   :  { %2074 = vmatpush3.msra.mxu0 %v2607_v58  ;;  %2104 = vmatpush3.msra.mxu1 %v2488_v10 }
  0x79   :  { %2075 = vmatprep.subr.mxu0 %v2627_v1  ;;  %2105 = vmatprep.subr.mxu1 %v2490_v11 }
  0x7a   :  { %2076 = vmatpush3.msra.mxu0 %v2627_v1  ;;  %2106 = vmatpush3.msra.mxu1 %v2490_v11 }
  0x7b   :  { %2077 = vmatprep.subr.mxu0 %v2643_v13  ;;  %2107 = vmatprep.subr.mxu1 %v2499_v16 }
  0x7c   :  { %2078 = vmatpush3.msra.mxu0 %v2643_v13  ;;  %2108 = vmatpush3.msra.mxu1 %v2499_v16 }
  0x7d   :  { %2079 = vmatprep.subr.mxu0 %v2667_v40  ;;  %2109 = vmatprep.subr.mxu1 %v2521_v24 }
  0x7e   :  { %2080 = vmatpush3.msra.mxu0 %v2667_v40  ;;  %2110 = vmatpush3.msra.mxu1 %v2521_v24 }
  0x7f   :  { %2081 = vmatprep.subr.mxu0 %v2684_v55  ;;  %2111 = vmatprep.subr.mxu1 %v2527_v27 }
  0x80   :  { %2082 = vmatpush3.msra.mxu0 %v2684_v55  ;;  %2112 = vmatpush3.msra.mxu1 %v2527_v27 }
  0x81   :  { %2083 = vmatprep.subr.mxu0 %v2701_v7  ;;  %2113 = vmatprep.subr.mxu1 %v2546_v34 }
  0x82   :  { %2084 = vmatpush3.msra.mxu0 %v2701_v7  ;;  %2114 = vmatpush3.msra.mxu1 %v2546_v34 }
  0x83   :  { %2085 = vmatprep.subr.mxu0 %v2721_v37  ;;  %2115 = vmatprep.subr.mxu1 %v2571_v45 }
  0x84   :  { %2086 = vmatpush3.msra.mxu0 %v2721_v37  ;;  %2116 = vmatpush3.msra.mxu1 %v2571_v45 }
  0x85   :  { %2087 = vmatprep.subr.mxu0 %v2732_v51  ;;  %2117 = vmatprep.subr.mxu1 %v2578_v47 }
  0x86   :  { %2088 = vmatpush3.msra.mxu0 %v2732_v51  ;;  %2089 = vmatprep.mubr.f32.mxu0 %v2613_v61 }
  0x87   :  { %2118 = vmatpush3.msra.mxu1 %v2578_v47  ;;  %2090 = vmatmul.mubr.f32.vlgmr.msra.gmra.mxu0 %v2618_v62 }
  0x88   :  { %2119 = vmatprep.subr.mxu1 %v2604_v57  ;;  %2133 = vmatprep.subr.mxu0 %v2480_v3 }
  0x89   :  { %2120 = vmatpush3.msra.mxu1 %v2604_v57  ;;  %2134 = vmatpush3.msra.mxu0 %v2480_v3 }
  0x8a   :  { %2121 = vmatprep.subr.mxu1 %v2636_v8  ;;  %2135 = vmatprep.subr.mxu0 %v2482_v4 }
  0x8b   :  { %2092 = vmatprep.mubr.f32.mxu0 %v2777_v18  ;;  %2122 = vmatpush3.msra.mxu1 %v2636_v8 }
  0x8c   :  { %2136 = vmatpush3.msra.mxu0 %v2482_v4  ;;  %2123 = vmatprep.subr.mxu1 %v2654_v31 }
  0x8d   :  { %2093 = vmatmul.mubr.f32.gmra.mxu0 %v2782_v0  ;;  %2137 = vmatprep.subr.mxu0 %v2484_v5 }
  0x8e   :  { %2124 = vmatpush3.msra.mxu1 %v2654_v31  ;;  %2138 = vmatpush3.msra.mxu0 %v2484_v5 }
  0x8f   :  { %2125 = vmatprep.subr.mxu1 %v2671_v41  ;;  %2139 = vmatprep.subr.mxu0 %v2486_v9 }
  0x90   :  { %2126 = vmatpush3.msra.mxu1 %v2671_v41  ;;  %2127 = vmatprep.mubr.f32.mxu1 %v2613_v61  ;;  %v3271_v61 = vld [vmem:[#allocation14_spill] sm:$0xff] }
  0x91   :  { %2140 = vmatpush3.msra.mxu0 %v2486_v9  ;;  %2128 = vmatmul.mubr.f32.vlgmr.msra.gmra.mxu1 %v2618_v62  ;;  %v2962_v62 = vand.u32 4294901760, %v833_v20 }
  0x92   :  { %2141 = vmatprep.subr.mxu0 %v2488_v10  ;;  %2171 = vmatprep.subr.mxu1 %v2549_v36 }
  0x93   :  { %2142 = vmatpush3.msra.mxu0 %v2488_v10  ;;  %2172 = vmatpush3.msra.mxu1 %v2549_v36  ;;  %v3272_v36 = vld [vmem:[#allocation16_spill] sm:$0xff]  ;;  %v2975_v44 = vsub.f32 %v833_v20, %v2962_v62  ;;  %v930_v20 = vand.u32 4294901760, %v2980_v29 }
  0x94   :  { %2143 = vmatprep.subr.mxu0 %v2490_v11  ;;  %2173 = vmatprep.subr.mxu1 %v3271_v61 }
  0x95   :  { %2130 = vmatprep.mubr.f32.mxu1 %v2777_v18  ;;  %2144 = vmatpush3.msra.mxu0 %v2490_v11  ;;  %v3273_v18 = vld [vmem:[#allocation19_spill] sm:$0xff]  ;;  %v920_v19 = vand.u32 4294901760, %v2975_v44 }
  0x96   :  { %2174 = vmatpush3.msra.mxu1 %v3271_v61  ;;  %2145 = vmatprep.subr.mxu0 %v2499_v16 }
  0x97   :  { %2131 = vmatmul.mubr.f32.gmra.mxu1 %v2782_v0  ;;  %2175 = vmatprep.subr.mxu1 %v3272_v36  ;;  %v3274_v0 = vld [vmem:[#allocation22_spill] sm:$0xff]  ;;  %v921_v61 = vsub.f32 %v2975_v44, %v920_v19 }
  0x98   :  { %2146 = vmatpush3.msra.mxu0 %v2499_v16  ;;  %2176 = vmatpush3.msra.mxu1 %v3272_v36  ;;  %v931_v36 = vsub.f32 %v2980_v29, %v930_v20 }
  0x99   :  { %2147 = vmatprep.subr.mxu0 %v2521_v24  ;;  %2177 = vmatprep.subr.mxu1 %v3273_v18 }
  0x9a   :  { %2148 = vmatpush3.msra.mxu0 %v2521_v24  ;;  %2178 = vmatpush3.msra.mxu1 %v3273_v18  ;;  %v3279_v18 = vld [vmem:[#allocation27_spill] sm:$0xff] }
  0x9b   :  { %2149 = vmatprep.subr.mxu0 %v2527_v27  ;;  %2179 = vmatprep.subr.mxu1 %v3274_v0 }
  0x9c   :  { %2150 = vmatpush3.msra.mxu0 %v2527_v27  ;;  %2180 = vmatpush3.msra.mxu1 %v3274_v0  ;;  %v922_v0 = vand.u32 4294901760, %v921_v61 }
  0x9d   :  { %2151 = vmatprep.subr.mxu0 %v2546_v34  ;;  %2181 = vmatprep.subr.mxu1 %v3275_v43 }
  0x9e   :  { %2152 = vmatpush3.msra.mxu0 %v2546_v34  ;;  %2182 = vmatpush3.msra.mxu1 %v3275_v43  ;;  %v932_v43 = vand.u32 4294901760, %v931_v36 }
  0x9f   :  { %2153 = vmatprep.subr.mxu0 %v2571_v45  ;;  %2183 = vmatprep.subr.mxu1 %v3276_v46 }
  0xa0   :  { %2154 = vmatpush3.msra.mxu0 %v2571_v45  ;;  %2184 = vmatpush3.msra.mxu1 %v3276_v46 }
  0xa1   :  { %2155 = vmatprep.subr.mxu0 %v2578_v47  ;;  %2185 = vmatprep.subr.mxu1 %v3277_v53 }
  0xa2   :  { %2156 = vmatpush3.msra.mxu0 %v2578_v47  ;;  %2186 = vmatpush3.msra.mxu1 %v3277_v53  ;;  %v3284_v53 = vld [vmem:[#allocation17_spill] sm:$0xff] }
  0xa3   :  { %2157 = vmatprep.subr.mxu0 %v2604_v57  ;;  %2187 = vmatprep.subr.mxu1 %v3278_v25 }
  0xa4   :  { %2158 = vmatpush3.msra.mxu0 %v2604_v57  ;;  %2188 = vmatpush3.msra.mxu1 %v3278_v25 }
  0xa5   :  { %2159 = vmatprep.subr.mxu0 %v2636_v8  ;;  %2189 = vmatprep.subr.mxu1 %v3279_v18 }
  0xa6   :  { %2160 = vmatpush3.msra.mxu0 %v2636_v8  ;;  %2190 = vmatpush3.msra.mxu1 %v3279_v18 }
  0xa7   :  { %2161 = vmatprep.subr.mxu0 %v2654_v31  ;;  %2191 = vmatprep.subr.mxu1 %v2708_v2 }
  0xa8   :  { %2162 = vmatpush3.msra.mxu0 %v2654_v31  ;;  %2192 = vmatpush3.msra.mxu1 %v2708_v2  ;;  %v835_v2 = vmul.f32 %v2766_v12, %v2766_v12  ;;  %v3283_v12 = vld [vmem:[#allocation15_spill] sm:$0xff] }
  0xa9   :  { %2163 = vmatprep.subr.mxu0 %v2671_v41  ;;  %2193 = vmatprep.subr.mxu1 %v2725_v56 }
  0xaa   :  { %2164 = vmatpush3.msra.mxu0 %v2671_v41  ;;  %2194 = vmatpush3.msra.mxu1 %v2725_v56  ;;  %v3282_v56 = vld [vmem:[#allocation13_spill] sm:$0xff] }
  0xab   :  { %2165 = vmatprep.mubr.f32.mxu0 %v922_v0  ;;  %2195 = vmatprep.subr.mxu1 %v2736_v54 }
  0xac   :  { %2209 = vmatprep.subr.mxu0 %v2494_v14  ;;  %2166 = vmatmul.mubr.f32.vlgmr.msra.gmra.mxu0 %v932_v43 }
  0xad   :  { %2196 = vmatpush3.msra.mxu1 %v2736_v54  ;;  %2210 = vmatpush3.msra.mxu0 %v2494_v14  ;;  %v836_v14 = vmul.f32 %v2770_v38, %v2770_v38  ;;  %v3280_v54 = vld [vmem:[#allocation11_spill] sm:$0xff] }
  0xae   :  { %2197 = vmatprep.subr.mxu1 %v2746_v49  ;;  %2211 = vmatprep.subr.mxu0 %v2497_v15 }
  0xaf   :  { %2198 = vmatpush3.msra.mxu1 %v2746_v49  ;;  %2212 = vmatpush3.msra.mxu0 %v2497_v15  ;;  %v3040_v15 = vand.u32 4294901760, %v835_v2  ;;  %v3281_v49 = vld [vmem:[#allocation12_spill] sm:$0xff] }
  0xb0   :  { %2199 = vmatprep.subr.mxu1 %v2752_v50  ;;  %2213 = vmatprep.subr.mxu0 %v2502_v17 }
  0xb1   :  { %2200 = vmatpush3.msra.mxu1 %v2752_v50  ;;  %2214 = vmatpush3.msra.mxu0 %v2502_v17  ;;  %v3044_v17 = vand.u32 4294901760, %v836_v14  ;;  %v3053_v50 = vsub.f32 %v835_v2, %v3040_v15 }
  0xb2   :  { %2201 = vmatprep.subr.mxu1 %v2758_v35  ;;  %2215 = vmatprep.subr.mxu0 %v3280_v54 }
  0xb3   :  { %2202 = vmatpush3.msra.mxu1 %v2758_v35  ;;  %2203 = vmatprep.mubr.f32.mxu1 %v2962_v62  ;;  %v3058_v35 = vsub.f32 %v836_v14, %v3044_v17  ;;  %v940_v46 = vand.u32 4294901760, %v3053_v50 }
  0xb4   :  { %2216 = vmatpush3.msra.mxu0 %v3280_v54  ;;  %2204 = vmatmul.mubr.f32.vlgmr.msra.gmra.mxu1 %v2964_v32 }
  0xb5   :  { %2217 = vmatprep.subr.mxu0 %v3281_v49  ;;  %2247 = vmatprep.subr.mxu1 %v2480_v3  ;;  %v950_v25 = vand.u32 4294901760, %v3058_v35  ;;  %v941_v61 = vsub.f32 %v3053_v50, %v940_v46 }
  0xb6   :  { %2218 = vmatpush3.msra.mxu0 %v3281_v49  ;;  %2248 = vmatpush3.msra.mxu1 %v2480_v3 }
  0xb7   :  { %2219 = vmatprep.subr.mxu0 %v3282_v56  ;;  %2249 = vmatprep.subr.mxu1 %v2482_v4  ;;  %v951_v36 = vsub.f32 %v3058_v35, %v950_v25  ;;  %v942_v18 = vand.u32 4294901760, %v941_v61 }
  0xb8   :  { %2220 = vmatpush3.msra.mxu0 %v3282_v56  ;;  %2250 = vmatpush3.msra.mxu1 %v2482_v4 }
  0xb9   :  { %2221 = vmatprep.subr.mxu0 %v2543_v33  ;;  %2251 = vmatprep.subr.mxu1 %v2484_v5  ;;  %v952_v0 = vand.u32 4294901760, %v951_v36 }
  0xba   :  { %2222 = vmatpush3.msra.mxu0 %v2543_v33  ;;  %2252 = vmatpush3.msra.mxu1 %v2484_v5  ;;  %v3285_v33 = vld [vmem:[#allocation20_spill] sm:$0xff] }
  0xbb   :  { %2223 = vmatprep.subr.mxu0 %v3283_v12  ;;  %2253 = vmatprep.subr.mxu1 %v2486_v9 }
  0xbc   :  { %2224 = vmatpush3.msra.mxu0 %v3283_v12  ;;  %2254 = vmatpush3.msra.mxu1 %v2486_v9 }
  0xbd   :  { %2225 = vmatprep.subr.mxu0 %v3284_v53  ;;  %2255 = vmatprep.subr.mxu1 %v2488_v10 }
  0xbe   :  { %2226 = vmatpush3.msra.mxu0 %v3284_v53  ;;  %2256 = vmatpush3.msra.mxu1 %v2488_v10 }
  0xbf   :  { %2227 = vmatprep.subr.mxu0 %v3285_v33  ;;  %2257 = vmatprep.subr.mxu1 %v2490_v11 }
  0xc0   :  { %2228 = vmatpush3.msra.mxu0 %v3285_v33  ;;  %2258 = vmatpush3.msra.mxu1 %v2490_v11 }
  0xc1   :  { %2229 = vmatprep.subr.mxu0 %v2610_v60  ;;  %2259 = vmatprep.subr.mxu1 %v2499_v16 }
  0xc2   :  { %2230 = vmatpush3.msra.mxu0 %v2610_v60  ;;  %2260 = vmatpush3.msra.mxu1 %v2499_v16 }
  0xc3   :  { %2231 = vmatprep.subr.mxu0 %v2630_v6  ;;  %2261 = vmatprep.subr.mxu1 %v2521_v24 }
  0xc4   :  { %2232 = vmatpush3.msra.mxu0 %v2630_v6  ;;  %2262 = vmatpush3.msra.mxu1 %v2521_v24 }
  0xc5   :  { %2233 = vmatprep.subr.mxu0 %v2650_v30  ;;  %2263 = vmatprep.subr.mxu1 %v2527_v27 }
  0xc6   :  { %2234 = vmatpush3.msra.mxu0 %v2650_v30  ;;  %2264 = vmatpush3.msra.mxu1 %v2527_v27 }
  0xc7   :  { %2235 = vmatprep.subr.mxu0 %v2674_v48  ;;  %2265 = vmatprep.subr.mxu1 %v2546_v34 }
  0xc8   :  { %2168 = vmatprep.mubr.f32.mxu0 %v942_v18  ;;  %2236 = vmatpush3.msra.mxu0 %v2674_v48 }
  0xc9   :  { %2266 = vmatpush3.msra.mxu1 %v2546_v34  ;;  %2169 = vmatmul.mubr.f32.gmra.mxu0 %v952_v0 }
  0xca   :  { %2237 = vmatprep.subr.mxu0 %v2690_v63  ;;  %2267 = vmatprep.subr.mxu1 %v2571_v45 }
  0xcb   :  { %2238 = vmatpush3.msra.mxu0 %v2690_v63  ;;  %2268 = vmatpush3.msra.mxu1 %v2571_v45 }
  0xcc   :  { %2239 = vmatprep.subr.mxu0 %v2704_v59  ;;  %2269 = vmatprep.subr.mxu1 %v2578_v47 }
  0xcd   :  { %2240 = vmatpush3.msra.mxu0 %v2704_v59  ;;  %2241 = vmatprep.mubr.f32.mxu0 %v2975_v44 }
  0xce   :  { %2270 = vmatpush3.msra.mxu1 %v2578_v47  ;;  %2206 = vmatprep.mubr.f32.mxu1 %v3040_v15 }
  0xcf   :  { %2242 = vmatmul.mubr.f32.vlgmr.msra.gmra.mxu0 %v2980_v29  ;;  %2271 = vmatprep.subr.mxu1 %v2604_v57 }
  0xd0   :  { %2285 = vmatprep.subr.mxu0 %v2513_v21  ;;  %2207 = vmatmul.mubr.f32.gmra.mxu1 %v3044_v17 }
  0xd1   :  { %2272 = vmatpush3.msra.mxu1 %v2604_v57  ;;  %2286 = vmatpush3.msra.mxu0 %v2513_v21 }
  0xd2   :  { %2273 = vmatprep.subr.mxu1 %v2636_v8  ;;  %2287 = vmatprep.subr.mxu0 %v2516_v22 }
  0xd3   :  { %2244 = vmatprep.mubr.f32.mxu0 %v3053_v50  ;;  %2274 = vmatpush3.msra.mxu1 %v2636_v8 }
  0xd4   :  { %2288 = vmatpush3.msra.mxu0 %v2516_v22  ;;  %2275 = vmatprep.subr.mxu1 %v2654_v31 }
  0xd5   :  { %2245 = vmatmul.mubr.f32.gmra.mxu0 %v3058_v35  ;;  %2289 = vmatprep.subr.mxu0 %v2519_v23 }
  0xd6   :  { %2276 = vmatpush3.msra.mxu1 %v2654_v31  ;;  %2290 = vmatpush3.msra.mxu0 %v2519_v23 }
  0xd7   :  { %2277 = vmatprep.subr.mxu1 %v2671_v41  ;;  %2291 = vmatprep.subr.mxu0 %v2525_v26 }
  0xd8   :  { %2278 = vmatpush3.msra.mxu1 %v2671_v41  ;;  %2279 = vmatprep.mubr.f32.mxu1 %v920_v19 }
  0xd9   :  { %2292 = vmatpush3.msra.mxu0 %v2525_v26  ;;  %2280 = vmatmul.mubr.f32.vlgmr.msra.gmra.mxu1 %v930_v20 }
  0xda   :  { %2293 = vmatprep.subr.mxu0 %v2530_v28  ;;  %2323 = vmatprep.subr.mxu1 %v2480_v3 }
  0xdb   :  { %2294 = vmatpush3.msra.mxu0 %v2530_v28  ;;  %2324 = vmatpush3.msra.mxu1 %v2480_v3 }
  0xdc   :  { %2295 = vmatprep.subr.mxu0 %v2556_v39  ;;  %2325 = vmatprep.subr.mxu1 %v2482_v4 }
  0xdd   :  { %2282 = vmatprep.mubr.f32.mxu1 %v940_v46  ;;  %2296 = vmatpush3.msra.mxu0 %v2556_v39 }
  0xde   :  { %2326 = vmatpush3.msra.mxu1 %v2482_v4  ;;  %2297 = vmatprep.subr.mxu0 %v2562_v42 }
  0xdf   :  { %2283 = vmatmul.mubr.f32.gmra.mxu1 %v950_v25  ;;  %2327 = vmatprep.subr.mxu1 %v2484_v5 }
  0xe0   :  { %2298 = vmatpush3.msra.mxu0 %v2562_v42  ;;  %2328 = vmatpush3.msra.mxu1 %v2484_v5 }
  0xe1   :  { %2299 = vmatprep.subr.mxu0 %v2589_v52  ;;  %2329 = vmatprep.subr.mxu1 %v2486_v9 }
  0xe2   :  { %2300 = vmatpush3.msra.mxu0 %v2589_v52  ;;  %2330 = vmatpush3.msra.mxu1 %v2486_v9 }
  0xe3   :  { %2301 = vmatprep.subr.mxu0 %v2607_v58  ;;  %2331 = vmatprep.subr.mxu1 %v2488_v10 }
  0xe4   :  { %2302 = vmatpush3.msra.mxu0 %v2607_v58  ;;  %2332 = vmatpush3.msra.mxu1 %v2488_v10 }
  0xe5   :  { %2303 = vmatprep.subr.mxu0 %v2627_v1  ;;  %2333 = vmatprep.subr.mxu1 %v2490_v11 }
  0xe6   :  { %2304 = vmatpush3.msra.mxu0 %v2627_v1  ;;  %2334 = vmatpush3.msra.mxu1 %v2490_v11 }
  0xe7   :  { %2305 = vmatprep.subr.mxu0 %v2643_v13  ;;  %2335 = vmatprep.subr.mxu1 %v2499_v16 }
  0xe8   :  { %2306 = vmatpush3.msra.mxu0 %v2643_v13  ;;  %2336 = vmatpush3.msra.mxu1 %v2499_v16 }
  0xe9   :  { %2307 = vmatprep.subr.mxu0 %v2667_v40  ;;  %2337 = vmatprep.subr.mxu1 %v2521_v24 }
  0xea   :  { %2308 = vmatpush3.msra.mxu0 %v2667_v40  ;;  %2338 = vmatpush3.msra.mxu1 %v2521_v24 }
  0xeb   :  { %2309 = vmatprep.subr.mxu0 %v2684_v55  ;;  %2339 = vmatprep.subr.mxu1 %v2527_v27 }
  0xec   :  { %2310 = vmatpush3.msra.mxu0 %v2684_v55  ;;  %2340 = vmatpush3.msra.mxu1 %v2527_v27 }
  0xed   :  { %2311 = vmatprep.subr.mxu0 %v2701_v7  ;;  %2341 = vmatprep.subr.mxu1 %v2546_v34 }
  0xee   :  { %2312 = vmatpush3.msra.mxu0 %v2701_v7  ;;  %2342 = vmatpush3.msra.mxu1 %v2546_v34 }
  0xef   :  { %2313 = vmatprep.subr.mxu0 %v2721_v37  ;;  %2343 = vmatprep.subr.mxu1 %v2571_v45 }
  0xf0   :  { %2314 = vmatpush3.msra.mxu0 %v2721_v37  ;;  %2344 = vmatpush3.msra.mxu1 %v2571_v45 }
  0xf1   :  { %2315 = vmatprep.subr.mxu0 %v2732_v51  ;;  %2345 = vmatprep.subr.mxu1 %v2578_v47 }
  0xf2   :  { %2316 = vmatpush3.msra.mxu0 %v2732_v51  ;;  %2317 = vmatprep.mubr.f32.mxu0 %v2962_v62 }
  0xf3   :  { %2346 = vmatpush3.msra.mxu1 %v2578_v47  ;;  %2318 = vmatmul.mubr.f32.vlgmr.msra.gmra.mxu0 %v2964_v32 }
  0xf4   :  { %2347 = vmatprep.subr.mxu1 %v2604_v57  ;;  %2320 = vmatprep.mubr.f32.mxu0 %v3040_v15 }
  0xf5   :  { %2348 = vmatpush3.msra.mxu1 %v2604_v57  ;;  %2355 = vmatprep.mubr.f32.mxu1 %v2962_v62 }
  0xf6   :  { %2349 = vmatprep.subr.mxu1 %v2636_v8 }
  0xf7   :  { %2350 = vmatpush3.msra.mxu1 %v2636_v8  ;;  %2321 = vmatmul.mubr.f32.gmra.mxu0 %v3044_v17 }
  0xf8   :  { %2351 = vmatprep.subr.mxu1 %v2654_v31 }
  0xf9   :  { %2352 = vmatpush3.msra.mxu1 %v2654_v31 }
  0xfa   :  { %2353 = vmatprep.subr.mxu1 %v2671_v41 }
  0xfb   :  { %2354 = vmatpush3.msra.mxu1 %v2671_v41 }
  0xfc   :  { %2356 = vmatmul.mubr.f32.vlgmr.msra.gmra.mxu1 %v2964_v32 }
  0xfd   :  { %2358 = vmatprep.mubr.f32.mxu1 %v3040_v15 }
 0x100   :  { %2359 = vmatmul.mubr.f32.gmra.mxu1 %v3044_v17  ;;  %v1939_v3 = vpop.f32.mrf.mxu0 }
 0x102   :  { %v150_v4 = vpop.f32.mrf.mxu0 }
 0x108   :  { %v1977_v10 = vpop.f32.mrf.mxu1 }
 0x109   :  { %v338_v51 = vadd.f32 %v1977_v10, %v1939_v3 }
 0x10a   :  { %v331_v16 = vpop.f32.mrf.mxu1 }
 0x10b   :  { %v332_v62 = vadd.f32 %v331_v16, %v150_v4 }
 0x11d   :  { %v1942_v5 = vpop.f32.mrf.mxu0 }
 0x11f   :  { %v170_v9 = vpop.f32.mrf.mxu0 }
 0x123   :  { %v2015_v11 = vpop.f32.mrf.mxu0 }
 0x124   :  { %v1980_v22 = vpop.f32.mrf.mxu1  ;;  %v461_v32 = vadd.f32 %v2015_v11, %v338_v51 }
 0x125   :  { %v453_v21 = vpop.f32.mrf.mxu0  ;;  %v350_v44 = vadd.f32 %v1980_v22, %v1942_v5 }
 0x126   :  { %v343_v24 = vpop.f32.mrf.mxu1  ;;  %v454_v20 = vadd.f32 %v453_v21, %v332_v62 }
 0x127   :  { %v344_v43 = vadd.f32 %v343_v24, %v170_v9 }
 0x129   :  { %v2018_v23 = vpop.f32.mrf.mxu0 }
 0x12a   :  { %v475_v54 = vadd.f32 %v2018_v23, %v350_v44 }
 0x12b   :  { %v467_v27 = vpop.f32.mrf.mxu0 }
 0x12c   :  { %v468_v46 = vadd.f32 %v467_v27, %v344_v43 }
 0x12d   :  { %v2053_v26 = vpop.f32.mrf.mxu1 }
 0x12e   :  { %v572_v2 = vadd.f32 %v2053_v26, %v461_v32 }
 0x12f   :  { %v563_v34 = vpop.f32.mrf.mxu1 }
 0x130   :  { %v564_v15 = vadd.f32 %v563_v34, %v454_v20  ;;  %v2374_v20 = vld [vmem:[#allocation2 + $0x8] sm:$0xff] }
 0x133   :  { %v2056_v39 = vpop.f32.mrf.mxu1 }
 0x134   :  { %v588_v53 = vadd.f32 %v2056_v39, %v475_v54 }
 0x135   :  { %v579_v45 = vpop.f32.mrf.mxu1 }
 0x136   :  { %v580_v0 = vadd.f32 %v579_v45, %v468_v46 }
 0x147   :  { %v2091_v28 = vpop.f32.mrf.mxu0 }
 0x148   :  { %v713_v49 = vadd.f32 %v2091_v28, %v572_v2 }
 0x149   :  { %v706_v37 = vpop.f32.mrf.mxu0 }
 0x14a   :  { %v707_v25 = vadd.f32 %v706_v37, %v564_v15 }
 0x14d   :  { %v2094_v42 = vpop.f32.mrf.mxu0 }
 0x14e   :  { %v725_v3 = vadd.f32 %v2094_v42, %v588_v53 }
 0x14f   :  { %v718_v52 = vpop.f32.mrf.mxu0 }
 0x150   :  { %v719_v21 = vadd.f32 %v718_v52, %v580_v0 }
 0x151   :  { %v2129_v47 = vpop.f32.mrf.mxu1 }
 0x152   :  { %v818_v33 = vadd.f32 %v2129_v47, %v713_v49 }
 0x153   :  { %v811_v57 = vpop.f32.mrf.mxu1 }
 0x154   :  { %v812_v4 = vadd.f32 %v811_v57, %v707_v25  ;;  %v1608_v22 = vmul.f32 %v818_v33, %v818_v33 }
 0x156   :  { %v1607_v37 = vmul.f32 %v812_v4, %v812_v4 }
 0x157   :  { %v2132_v60 = vpop.f32.mrf.mxu1 }
 0x158   :  { %v830_v23 = vadd.f32 %v2132_v60, %v725_v3 }
 0x159   :  { %v823_v1 = vpop.f32.mrf.mxu1 }
 0x15a   :  { %v824_v39 = vadd.f32 %v823_v1, %v719_v21 }
 0x15c   :  { %v1609_v60 = vmul.f32 %v824_v39, %v824_v39 }
 0x16c   :  { %v2167_v55 = vpop.f32.mrf.mxu0 }
 0x16e   :  { %v924_v58 = vpop.f32.mrf.mxu0 }
 0x174   :  { %v2205_v7 = vpop.f32.mrf.mxu1 }
 0x175   :  { %v1112_v14 = vadd.f32 %v2205_v7, %v2167_v55 }
 0x176   :  { %v1105_v13 = vpop.f32.mrf.mxu1 }
 0x177   :  { %v1106_v50 = vadd.f32 %v1105_v13, %v924_v58 }
 0x189   :  { %v2170_v63 = vpop.f32.mrf.mxu0 }
 0x18b   :  { %v944_v6 = vpop.f32.mrf.mxu0 }
 0x18f   :  { %v2243_v8 = vpop.f32.mrf.mxu0 }
 0x190   :  { %v2208_v30 = vpop.f32.mrf.mxu1  ;;  %v1235_v35 = vadd.f32 %v2243_v8, %v1112_v14  ;;  %v2375_v14 = vld [vmem:[#allocation2] sm:$0xff] }
 0x191   :  { %v1227_v31 = vpop.f32.mrf.mxu0  ;;  %v1124_v12 = vadd.f32 %v2208_v30, %v2170_v63  ;;  %v1610_v63 = vmul.f32 %v830_v23, %v830_v23 }
 0x192   :  { %v1117_v40 = vpop.f32.mrf.mxu1  ;;  %v1228_v61 = vadd.f32 %v1227_v31, %v1106_v50 }
 0x193   :  { %v1118_v36 = vadd.f32 %v1117_v40, %v944_v6 }
 0x195   :  { %v2246_v41 = vpop.f32.mrf.mxu0 }
 0x196   :  { %v1249_v10 = vadd.f32 %v2246_v41, %v1124_v12 }
 0x197   :  { %v1241_v59 = vpop.f32.mrf.mxu0 }
 0x198   :  { %v1242_v26 = vadd.f32 %v1241_v59, %v1118_v36 }
 0x199   :  { %v2281_v48 = vpop.f32.mrf.mxu1 }
 0x19a   :  { %v1346_v18 = vadd.f32 %v2281_v48, %v1235_v35  ;;  %v2376_v35 = vld [vmem:[#allocation2 + $0x10] sm:$0xff] }
 0x19b   :  { %v1337_v29 = vpop.f32.mrf.mxu1 }
 0x19c   :  { %v1338_v11 = vadd.f32 %v1337_v29, %v1228_v61 }
 0x19f   :  { %v2284_v17 = vpop.f32.mrf.mxu1 }
 0x1a0   :  { %v1362_v27 = vadd.f32 %v2284_v17, %v1249_v10 }
 0x1a1   :  { %v1353_v5 = vpop.f32.mrf.mxu1 }
 0x1a2   :  { %v1354_v45 = vadd.f32 %v1353_v5, %v1242_v26 }
 0x1b3   :  { %v2319_v19 = vpop.f32.mrf.mxu0 }
 0x1b4   :  { %v1487_v16 = vadd.f32 %v2319_v19, %v1346_v18  ;;  %v1664_v19 = vld [vmem:[%s3211_s1] ss:$0 sm:$0xff]  ;;  %s2417_s1 = scalar_lea.vmem %s1652_s25, 512 }
 0x1b5   :  { %v1480_v56 = vpop.f32.mrf.mxu0  ;;  %p2418_p10 = scmp.ne.s32.totalorder %s1652_s25, %s2417_s1  ;;  %p2423_p12 = scmp.lt.s32.totalorder %s2417_s1, %s2417_s1 }
 0x1b6   :  { %v1481_v28 = vadd.f32 %v1480_v56, %v1338_v11 }
 0x1b7   :  { %v2322_v9 = vpop.f32.mrf.mxu0  ;;  %p2424_p13 = por %p2423_p12, %p2422_p11 }
 0x1b8   :  { %v1499_v42 = vadd.f32 %v2322_v9, %v1362_v27 }
 0x1b9   :  { %v1492_v47 = vpop.f32.mrf.mxu0  ;;  %p2425_p0 = pnand %p2424_p13, %p2418_p10 }
 0x1ba   :  { %v1493_v7 = vadd.f32 %v1492_v47, %v1354_v45 }
 0x1bc   :  { %v2357_v24 = vpop.f32.mrf.mxu1 }
 0x1bd   :  { %v1592_v34 = vadd.f32 %v2357_v24, %v1487_v16 }
 0x1be   :  { %v1585_v55 = vpop.f32.mrf.mxu1 }
 0x1bf   :  { %v1612_v57 = vsub.f32 %v1592_v34, %v1608_v22  ;;  %v1586_v58 = vadd.f32 %v1585_v55, %v1481_v28 }
 0x1c0   :  { %v2360_v6 = vpop.f32.mrf.mxu1 }
 0x1c1   :  { %v1616_v8 = vmax.f32 %v1612_v57, 0.0  ;;  %v1611_v52 = vsub.f32 %v1586_v58, %v1607_v37  ;;  %v1604_v13 = vadd.f32 %v2360_v6, %v1499_v42 }
 0x1c2   :  { %v1597_v30 = vpop.f32.mrf.mxu1 }
 0x1c3   :  { %v1620_v31 = vadd.f32 1e-05, %v1616_v8  ;;  %v1615_v40 = vmax.f32 %v1611_v52, 0.0  ;;  %v1614_v41 = vsub.f32 %v1604_v13, %v1610_v63  ;;  %v1598_v48 = vadd.f32 %v1597_v30, %v1493_v7 }
 0x1c5   :  { %2366 = vrsqrt.f32 %v1620_v31  ;;  %v1619_v1 = vadd.f32 1e-05, %v1615_v40  ;;  %v1618_v51 = vmax.f32 %v1614_v41, 0.0  ;;  %v1613_v59 = vsub.f32 %v1598_v48, %v1609_v60 }
 0x1c7   :  { %2368 = vrsqrt.f32 %v1619_v1  ;;  %v1622_v62 = vadd.f32 1e-05, %v1618_v51  ;;  %v1617_v32 = vmax.f32 %v1613_v59, 0.0 }
 0x1c9   :  { %2370 = vrsqrt.f32 %v1622_v62  ;;  %v1621_v44 = vadd.f32 1e-05, %v1617_v32 }
 0x1cb   :  { %2372 = vrsqrt.f32 %v1621_v44 }
 0x1d2   :  { %v2367_v29 = vpop.eup %2366 }
 0x1d3   :  { %v1628_v43 = vmul.f32 %v2374_v20, %v2367_v29 }
 0x1d4   :  { %v2369_v2 = vpop.eup %2368 }
 0x1d5   :  { %v1627_v54 = vmul.f32 %v2375_v14, %v2369_v2  ;;  %v1639_v15 = vmul.f32 %v1664_v19, %v1628_v43 }
 0x1d6   :  { %v2371_v49 = vpop.eup %2370 }
 0x1d7   :  { %v1630_v17 = vmul.f32 %v2371_v49, %v2770_v38  ;;  %v1638_v56 = vmul.f32 %v1664_v19, %v1627_v54  ;;  %1643 = vst [vmem:[#allocation7 + $0x8] sm:$0xff] %v1639_v15 }
 0x1d8   :  { %v2373_v50 = vpop.eup %2372 }
 0x1d9   :  { %v1629_v12 = vmul.f32 %v2376_v35, %v2373_v50  ;;  %v1641_v46 = vmul.f32 %v1664_v19, %v1630_v17  ;;  %1642 = vst [vmem:[#allocation7] sm:$0xff] %v1638_v56 }
 0x1db   :  { %v1640_v53 = vmul.f32 %v1664_v19, %v1629_v12  ;;  %1645 = vst [vmem:[#allocation7 + $0x18] sm:$0xff] %v1641_v46 }
 0x1dd   :  { %1644 = vst [vmem:[#allocation7 + $0x10] sm:$0xff] %v1640_v53 }
 0x1de   :  { %2428 = shalt.err (!%p2425_p0)
}
 0x1df   :  { %1657 = dma.vmem_to_hbm [thread:$0]  %s1652_s25, 512, %s3213_s3, [#allocation4], %s2444_s15, %s2444_s15, %s2445_s16  }
 0x1e0   :  { %2441 = dma.done.wait [#allocation4], 512  }
 0x1e1   :  { %2442 = vsyncadd [#allocation4], 4294966784 }
 0x1e2   :  { %1661 = vsyncpa [#allocation3], 1 }
 0x1e3   :  { %1662 = vsyncpa [#allocation6], 1 }
 0x1e4   :  { %1663 = vsyncpa [#allocation4], 1 }

</bundles_post_ra>
